<compile_context>
chip_gen: v7x
topology: tpu7x:2x2x1
jax: 0.10.0
libtpu: 0.0.40
codegen_flags: <defaults>
</compile_context>

<pallas_src>
import functools

import jax
import jax.numpy as jnp
from jax.experimental import pallas as pl
from jax.experimental.pallas import tpu as pltpu


TILE_B = 256  # max batch rows per grid step (MXU-height aligned, 8-sublane aligned)


def actor_kernel(x_ref, w1_ref, b1_ref, w2_ref, b2_ref, w3_ref, b3_ref, out_ref):
    x = x_ref[...]                                            # (tile_b, S) f32

    # fc1 + relu  (MXU matmul, f32 accumulate)
    h1 = jnp.dot(x, w1_ref[...], preferred_element_type=jnp.float32) + b1_ref[...]
    h1 = jnp.maximum(h1, 0.0)                                 # (tile_b, 64)

    # fc2 + relu
    h2 = jnp.dot(h1, w2_ref[...], preferred_element_type=jnp.float32) + b2_ref[...]
    h2 = jnp.maximum(h2, 0.0)                                 # (tile_b, 64)

    # fc3
    logits = jnp.dot(h2, w3_ref[...], preferred_element_type=jnp.float32) + b3_ref[...]

    # Numerically stable softmax over the action dim.
    m = jnp.max(logits, axis=-1, keepdims=True)
    e = jnp.exp(logits - m)                                   # EUP
    denom = jnp.sum(e, axis=-1, keepdims=True)
    # EUP approx reciprocal (co-issues for free) + one Newton step -> f32 accuracy.
    inv = pl.reciprocal(denom, approx=True)
    inv = inv * (2.0 - denom * inv)
    out_ref[...] = e * inv


def _round_up(n, m):
    return ((n + m - 1) // m) * m


@functools.partial(jax.jit, static_argnames=("max_tile_b",))
def actor_forward(state, params, max_tile_b=TILE_B):
    """state: (B, num_states) f32 -> action_probs: (B, num_actions) f32."""
    w1, b1, w2, b2, w3, b3 = params
    B, S = state.shape
    A = w3.shape[1]

    # Adaptive tile: small batches -> one small (8-row aligned) tile, large
    # batches -> 256-row tiles over a grid.
    tile_b = min(max_tile_b, max(8, _round_up(B, 8)))
    padded_B = _round_up(max(B, tile_b), tile_b)
    if padded_B != B:
        state_p = jnp.zeros((padded_B, S), state.dtype).at[:B].set(state)
    else:
        state_p = state

    grid = (padded_B // tile_b,)

    # Grid-invariant blocks: weights/biases stay resident in VMEM across steps.
    def resident(shape):
        return pl.BlockSpec(shape, lambda i, _n=len(shape): (0,) * _n)

    out = pl.pallas_call(
        actor_kernel,
        out_shape=jax.ShapeDtypeStruct((padded_B, A), jnp.float32),
        grid_spec=pltpu.PrefetchScalarGridSpec(
            num_scalar_prefetch=0,
            grid=grid,
            in_specs=[
                pl.BlockSpec((tile_b, S), lambda i: (i, 0)),   # state tile per step
                resident(w1.shape), resident(b1.shape),
                resident(w2.shape), resident(b2.shape),
                resident(w3.shape), resident(b3.shape),
            ],
            out_specs=pl.BlockSpec((tile_b, A), lambda i: (i, 0)),
        ),
        compiler_params=pltpu.CompilerParams(
            dimension_semantics=("parallel",),   # v7x: both TCs split the batch
        ),
    )(state_p, w1, b1, w2, b2, w3, b3)

    return out[:B]


def init_actor_params(key, num_states, num_actions, hidden=64):
    """Deterministic synthetic init (PyTorch nn.Linear-like uniform fan-in)."""
    ks = jax.random.split(key, 6)

    def lin(kw, kb, fan_in, fan_out):
        bound = 1.0 / jnp.sqrt(fan_in)
        # Store W as (fan_in, fan_out) so kernel computes x @ W (== x @ W_torch^T).
        w = jax.random.uniform(kw, (fan_in, fan_out), jnp.float32, -bound, bound)
        b = jax.random.uniform(kb, (1, fan_out), jnp.float32, -bound, bound)
        return w, b

    w1, b1 = lin(ks[0], ks[1], num_states, hidden)
    w2, b2 = lin(ks[2], ks[3], hidden, hidden)
    w3, b3 = lin(ks[4], ks[5], hidden, num_actions)
    return (w1, b1, w2, b2, w3, b3)


if __name__ == "__main__":
    key = jax.random.PRNGKey(0)
    k_state, k_params, k_big = jax.random.split(key, 3)

    batch = 8
    num_states = 16
    num_actions = 4

    state = jax.random.normal(k_state, (batch, num_states), dtype=jnp.float32)
    params = init_actor_params(k_params, num_states, num_actions)

    def ref_fwd(s):
        w1, b1, w2, b2, w3, b3 = params
        h1 = jnp.maximum(s @ w1 + b1, 0.0)
        h2 = jnp.maximum(h1 @ w2 + b2, 0.0)
        return jax.nn.softmax(h2 @ w3 + b3, axis=-1)

    # Small-batch path (single 8-row tile, no wasted 256-row padding).
    action_probs = jax.block_until_ready(actor_forward(state, params))
    assert action_probs.shape == (batch, num_actions)
    assert jnp.allclose(jnp.sum(action_probs, axis=-1), 1.0, atol=1e-5)
    assert jnp.allclose(action_probs, ref_fwd(state), atol=1e-5)

    # Batched path: multiple grid steps + non-multiple-of-tile padding.
    big_batch = 600
    big_state = jax.random.normal(k_big, (big_batch, num_states), dtype=jnp.float32)
    big_probs = jax.block_until_ready(actor_forward(big_state, params))
    assert big_probs.shape == (big_batch, num_actions)
    assert jnp.allclose(jnp.sum(big_probs, axis=-1), 1.0, atol=1e-5)
    assert jnp.allclose(big_probs, ref_fwd(big_state), atol=1e-5)

    print("KERNEL_OK")
</pallas_src>

<mosaic_0001>
module attributes {stable_mosaic.version = 11 : i64} {
  func.func @actor_kernel(%arg0: i32, %arg1: memref<8x16xf32, #tpu.memory_space<vmem>>, %arg2: memref<16x64xf32, #tpu.memory_space<vmem>>, %arg3: memref<1x64xf32, #tpu.memory_space<vmem>>, %arg4: memref<64x64xf32, #tpu.memory_space<vmem>>, %arg5: memref<1x64xf32, #tpu.memory_space<vmem>>, %arg6: memref<64x4xf32, #tpu.memory_space<vmem>>, %arg7: memref<1x4xf32, #tpu.memory_space<vmem>>, %arg8: memref<8x4xf32, #tpu.memory_space<vmem>>) attributes {dimension_semantics = [#tpu.dimension_semantics<parallel>], iteration_bounds = array<i64: 1>, scalar_prefetch = 0 : i64, scratch_operands = 0 : i64, tpu.core_type = #tpu.core_type<tc>, window_params = [{transform_indices = @transform_0, window_bounds = array<i64: 8, 16>}, {pipeline_mode = #tpu.pipeline_mode<synchronous>, transform_indices = @transform_1, window_bounds = array<i64: 16, 64>}, {pipeline_mode = #tpu.pipeline_mode<synchronous>, transform_indices = @transform_2, window_bounds = array<i64: 1, 64>}, {pipeline_mode = #tpu.pipeline_mode<synchronous>, transform_indices = @transform_3, window_bounds = array<i64: 64, 64>}, {pipeline_mode = #tpu.pipeline_mode<synchronous>, transform_indices = @transform_4, window_bounds = array<i64: 1, 64>}, {pipeline_mode = #tpu.pipeline_mode<synchronous>, transform_indices = @transform_5, window_bounds = array<i64: 64, 4>}, {pipeline_mode = #tpu.pipeline_mode<synchronous>, transform_indices = @transform_6, window_bounds = array<i64: 1, 4>}, {transform_indices = @transform_7, window_bounds = array<i64: 8, 4>}]} {
    %c0 = arith.constant 0 : index
    %c0_0 = arith.constant 0 : index
    %0 = vector.load %arg1[%c0, %c0_0] : memref<8x16xf32, #tpu.memory_space<vmem>>, vector<8x16xf32>
    %c0_1 = arith.constant 0 : index
    %c0_2 = arith.constant 0 : index
    %1 = vector.load %arg2[%c0_1, %c0_2] : memref<16x64xf32, #tpu.memory_space<vmem>>, vector<16x64xf32>
    %cst = arith.constant dense<0.000000e+00> : vector<8x64xf32>
    %2 = tpu.matmul %0, %1, %cst {dimension_numbers = #tpu.dot_dimension_numbers<[1], [0], [0], [1], [0, 0, 1, 1], [], []>} : vector<8x16xf32>, vector<16x64xf32>, vector<8x64xf32> -> vector<8x64xf32>
    %c0_3 = arith.constant 0 : index
    %c0_4 = arith.constant 0 : index
    %3 = vector.load %arg3[%c0_3, %c0_4] : memref<1x64xf32, #tpu.memory_space<vmem>>, vector<1x64xf32>
    %4 = vector.broadcast %3 : vector<1x64xf32> to vector<8x64xf32>
    %5 = arith.addf %2, %4 : vector<8x64xf32>
    %cst_5 = arith.constant 0.000000e+00 : f32
    %6 = vector.broadcast %cst_5 : f32 to vector<8x64xf32>
    %7 = arith.maximumf %5, %6 : vector<8x64xf32>
    %c0_6 = arith.constant 0 : index
    %c0_7 = arith.constant 0 : index
    %8 = vector.load %arg4[%c0_6, %c0_7] : memref<64x64xf32, #tpu.memory_space<vmem>>, vector<64x64xf32>
    %cst_8 = arith.constant dense<0.000000e+00> : vector<8x64xf32>
    %9 = tpu.matmul %7, %8, %cst_8 {dimension_numbers = #tpu.dot_dimension_numbers<[1], [0], [0], [1], [0, 0, 1, 1], [], []>} : vector<8x64xf32>, vector<64x64xf32>, vector<8x64xf32> -> vector<8x64xf32>
    %c0_9 = arith.constant 0 : index
    %c0_10 = arith.constant 0 : index
    %10 = vector.load %arg5[%c0_9, %c0_10] : memref<1x64xf32, #tpu.memory_space<vmem>>, vector<1x64xf32>
    %11 = vector.broadcast %10 : vector<1x64xf32> to vector<8x64xf32>
    %12 = arith.addf %9, %11 : vector<8x64xf32>
    %cst_11 = arith.constant 0.000000e+00 : f32
    %13 = vector.broadcast %cst_11 : f32 to vector<8x64xf32>
    %14 = arith.maximumf %12, %13 : vector<8x64xf32>
    %c0_12 = arith.constant 0 : index
    %c0_13 = arith.constant 0 : index
    %15 = vector.load %arg6[%c0_12, %c0_13] : memref<64x4xf32, #tpu.memory_space<vmem>>, vector<64x4xf32>
    %cst_14 = arith.constant dense<0.000000e+00> : vector<8x4xf32>
    %16 = tpu.matmul %14, %15, %cst_14 {dimension_numbers = #tpu.dot_dimension_numbers<[1], [0], [0], [1], [0, 0, 1, 1], [], []>} : vector<8x64xf32>, vector<64x4xf32>, vector<8x4xf32> -> vector<8x4xf32>
    %c0_15 = arith.constant 0 : index
    %c0_16 = arith.constant 0 : index
    %17 = vector.load %arg7[%c0_15, %c0_16] : memref<1x4xf32, #tpu.memory_space<vmem>>, vector<1x4xf32>
    %18 = vector.broadcast %17 : vector<1x4xf32> to vector<8x4xf32>
    %19 = arith.addf %16, %18 : vector<8x4xf32>
    %cst_17 = arith.constant dense<0xFF800000> : vector<8xf32>
    %20 = vector.multi_reduction <maximumf>, %19, %cst_17 [1] : vector<8x4xf32> to vector<8xf32>
    %21 = vector.shape_cast %20 : vector<8xf32> to vector<8x1xf32>
    %22 = vector.broadcast %21 : vector<8x1xf32> to vector<8x4xf32>
    %23 = arith.subf %19, %22 : vector<8x4xf32>
    %24 = math.exp %23 : vector<8x4xf32>
    %cst_18 = arith.constant dense<0.000000e+00> : vector<8xf32>
    %25 = vector.multi_reduction <add>, %24, %cst_18 [1] : vector<8x4xf32> to vector<8xf32>
    %26 = vector.shape_cast %25 : vector<8xf32> to vector<8x1xf32>
    %27 = tpu.reciprocal %26 {approx = true} : vector<8x1xf32> -> vector<8x1xf32>
    %28 = arith.mulf %26, %27 : vector<8x1xf32>
    %cst_19 = arith.constant 2.000000e+00 : f32
    %29 = vector.broadcast %cst_19 : f32 to vector<8x1xf32>
    %30 = arith.subf %29, %28 : vector<8x1xf32>
    %31 = arith.mulf %27, %30 : vector<8x1xf32>
    %32 = vector.broadcast %31 : vector<8x1xf32> to vector<8x4xf32>
    %33 = arith.mulf %24, %32 : vector<8x4xf32>
    %c0_20 = arith.constant 0 : index
    %c0_21 = arith.constant 0 : index
    %34 = vector.load %arg8[%c0_20, %c0_21] : memref<8x4xf32, #tpu.memory_space<vmem>>, vector<8x4xf32>
    tpu.vector_store %arg8[%c0_20, %c0_21], %33 {strides = array<i32>} : memref<8x4xf32, #tpu.memory_space<vmem>>, vector<8x4xf32>,
    return
  }
  func.func @transform_0(%arg0: i32) -> (i32, i32) {
    %c0_i32 = arith.constant 0 : i32
    %c0_i32_0 = arith.constant 0 : i32
    return %arg0, %c0_i32 : i32, i32
  }
  func.func @transform_1(%arg0: i32) -> (i32, i32) {
    %c0_i32 = arith.constant 0 : i32
    %c0_i32_0 = arith.constant 0 : i32
    %c0_i32_1 = arith.constant 0 : i32
    return %c0_i32, %c0_i32_0 : i32, i32
  }
  func.func @transform_2(%arg0: i32) -> (i32, i32) {
    %c0_i32 = arith.constant 0 : i32
    %c0_i32_0 = arith.constant 0 : i32
    %c0_i32_1 = arith.constant 0 : i32
    return %c0_i32, %c0_i32_0 : i32, i32
  }
  func.func @transform_3(%arg0: i32) -> (i32, i32) {
    %c0_i32 = arith.constant 0 : i32
    %c0_i32_0 = arith.constant 0 : i32
    %c0_i32_1 = arith.constant 0 : i32
    return %c0_i32, %c0_i32_0 : i32, i32
  }
  func.func @transform_4(%arg0: i32) -> (i32, i32) {
    %c0_i32 = arith.constant 0 : i32
    %c0_i32_0 = arith.constant 0 : i32
    %c0_i32_1 = arith.constant 0 : i32
    return %c0_i32, %c0_i32_0 : i32, i32
  }
  func.func @transform_5(%arg0: i32) -> (i32, i32) {
    %c0_i32 = arith.constant 0 : i32
    %c0_i32_0 = arith.constant 0 : i32
    %c0_i32_1 = arith.constant 0 : i32
    return %c0_i32, %c0_i32_0 : i32, i32
  }
  func.func @transform_6(%arg0: i32) -> (i32, i32) {
    %c0_i32 = arith.constant 0 : i32
    %c0_i32_0 = arith.constant 0 : i32
    %c0_i32_1 = arith.constant 0 : i32
    return %c0_i32, %c0_i32_0 : i32, i32
  }
  func.func @transform_7(%arg0: i32) -> (i32, i32) {
    %c0_i32 = arith.constant 0 : i32
    %c0_i32_0 = arith.constant 0 : i32
    return %arg0, %c0_i32 : i32, i32
  }
}

</mosaic_0001>

<bundles_post_ra>
// kernel: actor_forward.1
= control target key start
LH: loop header
LB: loop body
LE: loop exit
PB: predicated region body
PF: predicated region fallthrough
CT: control target
= control target key end

     0   :  { %12 = vsyncpa [#allocation3], 0  ;;  %s457_s24 = smov [#allocation2]   ;;  %s584_s0 = inlined_call_operand.vmem [shape: f32[8,16], index: 0, kind: input, shape index: {}]   ;;  %s585_s1 = inlined_call_operand.hbm [shape: f32[16,64], index: 1, kind: input, shape index: {}]   ;;  %s586_s2 = inlined_call_operand.vmem [shape: f32[1,64], index: 2, kind: input, shape index: {}]   ;;  %s587_s3 = inlined_call_operand.vmem [shape: f32[64,64], index: 3, kind: input, shape index: {}]   ;;  %s588_s4 = inlined_call_operand.vmem [shape: f32[1,64], index: 4, kind: input, shape index: {}]   ;;  %s589_s5 = inlined_call_operand.vmem [shape: f32[64,4], index: 5, kind: input, shape index: {}]   ;;  %s590_s6 = inlined_call_operand.vmem [shape: f32[1,4], index: 6, kind: input, shape index: {}]   ;;  %s591_s7 = inlined_call_operand.vmem [shape: f32[8,4], index: 7, kind: output, shape index: {}]  }
   0x1   :  { %s20_s25 = sshll.u32 %s457_s24, 4  ;;  %s433_s28 = scalar_lea.hbm %s585_s1, 256  ;;  %s21_s25 = int_to_ptr.vmem [resolvable:$true] %s20_s25 }
   0x2   :  { %p434_p0 = scmp.ne.s32.totalorder %s585_s1, %s433_s28  ;;  %p437_p1 = scmp.lt.u32.totalorder %s433_s28, %s585_s1 }
   0x4   :  { %p439_p2 = pnand %p437_p1, %p434_p0 }
   0x6   :  { %442 = shalt.err (!%p439_p2)
}
   0x7   :  { %s443_s10 = scalar_lea.vmem %s21_s25, 256  ;;  %p448_p4 = scmp.lt.s32.totalorder %s21_s25, %s21_s25 }
   0x8   :  { %p444_p3 = scmp.ne.s32.totalorder %s21_s25, %s443_s10  ;;  %p449_p5 = scmp.lt.s32.totalorder %s443_s10, %s443_s10 }
   0xa   :  { %p450_p6 = por %p449_p5, %p448_p4 }
   0xc   :  { %p451_p7 = pnand %p450_p6, %p444_p3 }
   0xe   :  { %454 = shalt.err (!%p451_p7)
}
   0xf   :  { %s458_s11 = smov 128   ;;  %s459_s12 = smov 8  }
  0x10   :  { %26 = dma.hbm_to_vmem [thread:$0]  %s585_s1, 256, %s21_s25, [#allocation3], %s458_s11, %s458_s11, %s459_s12  }
  0x11   :  { %455 = dma.done.wait [#allocation3], 256  }
  0x12   :  { %456 = vsyncadd [#allocation3], 4294967040  ;;  %v460_v0 = vmov 0.0|0.0   ;;  %vm461_vm0 = vmmov 0   ;;  %v462_v1 = vmov 0.0   ;;  %v41_v2 = vld [vmem:[#allocation2] sm:$0xff] }
  0x13   :  { %396 = vmatprep.subr.bf16.mxu0 %v460_v0  ;;  %355 = vmatprep.mubr.msk.f32.mxu0 %vm461_vm0, %v462_v1  ;;  %v42_v3 = vld [vmem:[#allocation2 + $0x8] sm:$0xff]  ;;  %v125_v5 = vld [vmem:[%s587_s3] sm:$0xff]  ;;  %v127_v7 = vld [vmem:[%s587_s3 + $0x10] sm:$0xff]  ;;  %vm50_vm1 = vcmask 130048   ;;  %vm140_vm2 = vcmask 523264   ;;  %vm303_vm3 = vcmask 31744  }
  0x14   :  { %399 = vmatprep.subr.bf16.mxu1 %v460_v0  ;;  %374 = vmatprep.mubr.msk.f32.mxu1 %vm461_vm0, %v462_v1  ;;  %v397_v4 = vpack.c.bf16 %v42_v3, %v41_v2  ;;  %v126_v6 = vld [vmem:[%s587_s3 + $0x8] sm:$0xff]  ;;  %v128_v9 = vld [vmem:[%s587_s3 + $0x18] sm:$0xff]  ;;  %v40_v10 = vld [vmem:[%s584_s0] sm:$0xff] }
  0x15   :  { %v400_v8 = vpack.c.bf16 %v126_v6, %v125_v5  ;;  %v403_v11 = vpack.c.bf16 %v128_v9, %v127_v7  ;;  %v129_v12 = vld [vmem:[%s587_s3 + $0x20] sm:$0xff]  ;;  %v130_v13 = vld [vmem:[%s587_s3 + $0x28] sm:$0xff]  ;;  %v131_v15 = vld [vmem:[%s587_s3 + $0x30] sm:$0xff] }
  0x16   :  { %398 = vmatpush3.bf16.msra.mxu0 %v397_v4  ;;  %v406_v14 = vpack.c.bf16 %v130_v13, %v129_v12  ;;  %v132_v16 = vld [vmem:[%s587_s3 + $0x38] sm:$0xff]  ;;  %v215_v18 = vld [vmem:[%s589_s5] sm:$0xff]  ;;  %v216_v19 = vld [vmem:[%s589_s5 + $0x8] sm:$0xff] }
  0x17   :  { %401 = vmatpush3.bf16.msra.mxu1 %v400_v8  ;;  %411 = vmatprep.subr.bf16.mxu0 %v460_v0  ;;  %v409_v17 = vpack.c.bf16 %v132_v16, %v131_v15  ;;  %v217_v20 = vld [vmem:[%s589_s5 + $0x10] sm:$0xff]  ;;  %v412_v21 = vpack.c.bf16 %v216_v19, %v215_v18  ;;  %v218_v22 = vld [vmem:[%s589_s5 + $0x18] sm:$0xff]  ;;  %v219_v24 = vld [vmem:[%s589_s5 + $0x20] sm:$0xff] }
  0x18   :  { %402 = vmatprep.subr.bf16.mxu1 %v460_v0  ;;  %v415_v23 = vpack.c.bf16 %v218_v22, %v217_v20  ;;  %v220_v25 = vld [vmem:[%s589_s5 + $0x28] sm:$0xff]  ;;  %v324_v27 = vld [vmem:[%s586_s2] ss:$0 sm:$0xff]  ;;  %v221_v32 = vld [vmem:[%s589_s5 + $0x30] sm:$0xff] }
  0x19   :  { %356 = vmatmul.mubr.msk.f32.vlgmr.msra.gmra.mrb[0].mxu0 %vm50_vm1, %v40_v10  ;;  %v418_v26 = vpack.c.bf16 %v220_v25, %v219_v24  ;;  %v222_v33 = vld [vmem:[%s589_s5 + $0x38] sm:$0xff]  ;;  %v326_v35 = vld [vmem:[%s588_s4] ss:$0 sm:$0xff] }
  0x1a   :  { %393 = vmatprep.mubr.msk.f32.mxu0 %vm461_vm0, %v462_v1  ;;  %413 = vmatpush3.bf16.msra.mxu0 %v412_v21  ;;  %v421_v34 = vpack.c.bf16 %v222_v33, %v221_v32  ;;  %v328_v40 = vld [vmem:[%s590_s6] ss:$0 sm:$0xff] }
  0x1b   :  { %404 = vmatpush3.bf16.msra.mxu1 %v403_v11  ;;  %414 = vmatprep.subr.bf16.mxu0 %v460_v0 }
  0x1c   :  { %405 = vmatprep.subr.bf16.mxu1 %v460_v0 }
  0x1e   :  { %416 = vmatpush3.bf16.msra.mxu0 %v415_v23 }
  0x1f   :  { %407 = vmatpush3.bf16.msra.mxu1 %v406_v14  ;;  %417 = vmatprep.subr.bf16.mxu0 %v460_v0 }
  0x20   :  { %408 = vmatprep.subr.bf16.mxu1 %v460_v0 }
  0x22   :  { %419 = vmatpush3.bf16.msra.mxu0 %v418_v26 }
  0x23   :  { %410 = vmatpush3.bf16.msra.mxu1 %v409_v17  ;;  %420 = vmatprep.subr.bf16.mxu0 %v460_v0 }
  0x26   :  { %422 = vmatpush3.bf16.msra.mxu0 %v421_v34 }
  0xec   :  { %v120_v28 = vpop.f32.mrb[0].mxu0 }
  0xed   :  { %v121_v29 = vadd.f32 %v324_v27, %v120_v28  ;;  %v357_v30 = vpop.f32.mrb[1].mxu0 }
  0xef   :  { %v124_v31 = vmax.f32 %v121_v29, 0.0 }
  0xf1   :  { %375 = vmatmul.mubr.msk.f32.vlgmr.msra.gmra.mrb[0].mxu1 %vm140_vm2, %v124_v31 }
 0x1c4   :  { %v210_v36 = vpop.f32.mrb[0].mxu1 }
 0x1c5   :  { %v211_v37 = vadd.f32 %v326_v35, %v210_v36  ;;  %v376_v38 = vpop.f32.mrb[1].mxu1 }
 0x1c7   :  { %v214_v39 = vmax.f32 %v211_v37, 0.0 }
 0x1c9   :  { %394 = vmatmul.mubr.msk.f32.vlgmr.msra.gmra.mrb[2].mxu0 %vm140_vm2, %v214_v39 }
 0x29c   :  { %v299_v41 = vpop.f32.mrb[2].mxu0 }
 0x29d   :  { %v300_v42 = vadd.f32 %v328_v40, %v299_v41  ;;  %v395_v43 = vpop.f32.mrb[3].mxu0 }
 0x29f   :  { %v304_v44 = vsel %vm303_vm3, %v300_v42, -inf }
 0x2a0   :  { %305 = vmax.xlane.f32.xlu0 %v304_v44 }
 0x32d   :  { %v306_v45 = vpop.xlane.xlu0 %305 }
 0x32e   :  { %v307_v46 = vsub.f32 %v300_v42, %v306_v45 }
 0x330   :  { %v308_v47 = vmul.f32 1.442695, %v307_v46 }
 0x332   :  { %429 = vpow2.f32 %v308_v47 }
 0x33c   :  { %v430_v48 = vpop.eup %429 }
 0x33d   :  { %v310_v49 = vsel %vm303_vm3, %v430_v48, 0.0 }
 0x33e   :  { %311 = vadd.xlane.f32.xlu0 %v310_v49 }
 0x3cb   :  { %v312_v50 = vpop.xlane.xlu0 %311 }
 0x3cc   :  { %431 = vrcp.f32 %v312_v50 }
 0x3d6   :  { %v432_v51 = vpop.eup %431 }
 0x3d7   :  { %v314_v52 = vmul.f32 %v432_v51, %v312_v50 }
 0x3d9   :  { %v315_v53 = vsub.f32 2.0, %v314_v52 }
 0x3db   :  { %v316_v54 = vmul.f32 %v432_v51, %v315_v53 }
 0x3dd   :  { %v317_v55 = vmul.f32 %v430_v48, %v316_v54 }
 0x3df   :  { %318 = vst.msk [vmem:[%s591_s7] sm:$0xff] %vm303_vm3, %v317_v55 }
 0x3e0   :  { %323 = vsyncpa [#allocation3], 1 }

</bundles_post_ra>
